<compile_context>
chip_gen: v7x
topology: tpu7x:2x2x1
jax: 0.10.0
libtpu: 0.0.40
codegen_flags: <defaults>
</compile_context>

<pallas_src>
import functools

import jax
import jax.numpy as jnp
from jax.experimental import pallas as pl
from jax.experimental.pallas import tpu as pltpu

_MASK = -1e30  # finite "minus infinity" so padded / fully-masked rows never produce NaN


def _round_up(x, m):
    return ((x + m - 1) // m) * m


# ----------------------------------------------------------------------------
# Kernel 1: row-wise L2 normalization  (F.normalize(x, p=2, dim=1))
# ----------------------------------------------------------------------------
def _l2_normalize_kernel(x_ref, o_ref):
    x = x_ref[...]
    norm = jnp.sqrt(jnp.sum(x * x, axis=-1, keepdims=True))
    o_ref[...] = x * (1.0 / jnp.maximum(norm, 1e-12))


def l2_normalize(x, block_rows):
    n, d = x.shape
    return pl.pallas_call(
        _l2_normalize_kernel,
        out_shape=jax.ShapeDtypeStruct((n, d), x.dtype),
        grid_spec=pltpu.PrefetchScalarGridSpec(
            num_scalar_prefetch=0,
            grid=(n // block_rows,),
            in_specs=[pl.BlockSpec((block_rows, d), lambda i: (i, 0))],
            out_specs=pl.BlockSpec((block_rows, d), lambda i: (i, 0)),
        ),
        compiler_params=pltpu.CompilerParams(dimension_semantics=("parallel",)),
    )(x)


# ----------------------------------------------------------------------------
# Kernel 2: supervised NT-Xent loss, flash-style over column tiles
# ----------------------------------------------------------------------------
def _supcon_kernel(xr_ref, xc_ref, lr_ref, lc_ref,          # inputs
                   loss_ref, valid_ref,                     # outputs (per-row partials)
                   m_sc, l_sc, psum_sc, pcnt_sc,            # VMEM scratch (bm, 1)
                   *, inv_temp, n_valid, bm, bn):
    i = pl.program_id(0)
    j = pl.program_id(1)

    @pl.when(j == 0)
    def _():
        m_sc[...] = jnp.full_like(m_sc, _MASK)
        l_sc[...] = jnp.zeros_like(l_sc)
        psum_sc[...] = jnp.zeros_like(psum_sc)
        pcnt_sc[...] = jnp.zeros_like(pcnt_sc)

    xr = xr_ref[...]                                   # (bm, D) f32
    xc = xc_ref[...]                                   # (bn, D) f32
    # Contract the feature dim of both operands (trans_b on the MXU; no transpose).
    s = jax.lax.dot_general(
        xr, xc, (((1,), (1,)), ((), ())),
        preferred_element_type=jnp.float32) * inv_temp  # (bm, bn)

    row_ids = i * bm + jax.lax.broadcasted_iota(jnp.int32, (bm, bn), 0)
    col_ids = j * bn + jax.lax.broadcasted_iota(jnp.int32, (bm, bn), 1)
    in_bounds = (row_ids < n_valid) & (col_ids < n_valid)
    denom_mask = in_bounds & (row_ids != col_ids)                 # exclude self
    pos_mask = denom_mask & (lr_ref[...] == lc_ref[...])          # same label, not self

    # Online logsumexp over the masked scores.
    s_m = jnp.where(denom_mask, s, _MASK)
    m_new = jnp.maximum(m_sc[...], jnp.max(s_m, axis=-1, keepdims=True))
    alpha = jnp.exp(m_sc[...] - m_new)
    p = jnp.where(denom_mask, jnp.exp(s_m - m_new), 0.0)
    l_sc[...] = alpha * l_sc[...] + jnp.sum(p, axis=-1, keepdims=True)
    m_sc[...] = m_new

    # Positive-pair accumulation (raw scores and counts).
    psum_sc[...] += jnp.sum(jnp.where(pos_mask, s, 0.0), axis=-1, keepdims=True)
    pcnt_sc[...] += jnp.sum(pos_mask.astype(jnp.float32), axis=-1, keepdims=True)

    @pl.when(j == pl.num_programs(1) - 1)
    def _():
        row_id = i * bm + jax.lax.broadcasted_iota(jnp.int32, (bm, 1), 0)
        pcnt = pcnt_sc[...]
        valid = (row_id < n_valid) & (pcnt > 0.0)
        lse = m_sc[...] + jnp.log(jnp.maximum(l_sc[...], 1e-30))
        mean_pos = psum_sc[...] / jnp.maximum(pcnt, 1.0)
        per_row = lse - mean_pos
        loss_ref[...] = jnp.where(valid, per_row, 0.0)
        valid_ref[...] = valid.astype(jnp.float32)


def supervised_contrastive_loss(feature_vectors, labels, temperature,
                                block_rows=256, block_cols=512):
    n, d = feature_vectors.shape
    features = feature_vectors.astype(jnp.float32)
    labels = labels.reshape(-1).astype(jnp.int32)      # torch.squeeze(labels)

    # Tile selection: power-of-two multiples of 128 so bm | bn | n_pad always holds.
    bn = max(128, min(block_cols, pl.next_power_of_2(n)))
    bm = min(block_rows, bn)
    n_pad = _round_up(n, bn)

    x = jnp.pad(features, ((0, n_pad - n), (0, 0)))
    lab = jnp.pad(labels, (0, n_pad - n), constant_values=-1)

    xn = l2_normalize(x, bm)

    labels_row = lab.reshape(n_pad, 1)
    labels_col = lab.reshape(1, n_pad)

    kern = functools.partial(
        _supcon_kernel,
        inv_temp=float(1.0 / temperature),
        n_valid=n, bm=bm, bn=bn)

    loss_rows, valid_rows = pl.pallas_call(
        kern,
        out_shape=(jax.ShapeDtypeStruct((n_pad, 1), jnp.float32),
                   jax.ShapeDtypeStruct((n_pad, 1), jnp.float32)),
        grid_spec=pltpu.PrefetchScalarGridSpec(
            num_scalar_prefetch=0,
            grid=(n_pad // bm, n_pad // bn),
            in_specs=[
                pl.BlockSpec((bm, d), lambda i, j: (i, 0)),   # anchor rows
                pl.BlockSpec((bn, d), lambda i, j: (j, 0)),   # contrast rows (KV tile)
                pl.BlockSpec((bm, 1), lambda i, j: (i, 0)),   # anchor labels
                pl.BlockSpec((1, bn), lambda i, j: (0, j)),   # contrast labels
            ],
            out_specs=[
                pl.BlockSpec((bm, 1), lambda i, j: (i, 0)),
                pl.BlockSpec((bm, 1), lambda i, j: (i, 0)),
            ],
            scratch_shapes=[pltpu.VMEM((bm, 1), jnp.float32)] * 4,
        ),
        compiler_params=pltpu.CompilerParams(
            dimension_semantics=("parallel", "arbitrary")),
    )(xn, xn, labels_row, labels_col)

    # Tiny final reduction over N scalars (plain-JAX glue).
    total = jnp.sum(loss_rows)
    count = jnp.sum(valid_rows)
    return total / jnp.maximum(count, 1.0)


# ----------------------------------------------------------------------------
# Pure-JAX reference (mirrors the module's forward semantics), for sanity check
# ----------------------------------------------------------------------------
def reference_loss(feature_vectors, labels, temperature):
    x = feature_vectors.astype(jnp.float32)
    x = x / jnp.maximum(jnp.linalg.norm(x, axis=1, keepdims=True), 1e-12)
    logits = (x @ x.T) / temperature
    lab = labels.reshape(-1)
    n = x.shape[0]
    eye = jnp.eye(n, dtype=bool)
    denom_mask = ~eye
    pos_mask = (lab[:, None] == lab[None, :]) & ~eye
    lse = jax.scipy.special.logsumexp(jnp.where(denom_mask, logits, _MASK), axis=1)
    pos_cnt = jnp.sum(pos_mask, axis=1)
    pos_sum = jnp.sum(jnp.where(pos_mask, logits, 0.0), axis=1)
    has_pos = pos_cnt > 0
    per_row = lse - pos_sum / jnp.maximum(pos_cnt, 1)
    per_row = jnp.where(has_pos, per_row, 0.0)
    return jnp.sum(per_row) / jnp.maximum(jnp.sum(has_pos), 1)


if __name__ == "__main__":
    N, D, num_classes = 96, 32, 10       # N not a multiple of 128 -> exercises masking
    temperature = 0.1

    key = jax.random.PRNGKey(0)
    kf, kl = jax.random.split(key)
    feature_vectors = jax.random.normal(kf, (N, D), jnp.float32)
    labels = jax.random.randint(kl, (N, 1), 0, num_classes)   # (N, 1) like the module

    loss = supervised_contrastive_loss(feature_vectors, labels, temperature)
    loss = jax.block_until_ready(loss)

    ref = reference_loss(feature_vectors, labels, temperature)
    assert loss.shape == ()
    assert jnp.isfinite(loss)
    assert jnp.allclose(loss, ref, atol=1e-3, rtol=1e-3), (loss, ref)

    print("KERNEL_OK")
</pallas_src>

<mosaic_0001>
module attributes {stable_mosaic.version = 11 : i64} {
  func.func @_l2_normalize_kernel(%arg0: i32, %arg1: memref<128x32xf32, #tpu.memory_space<vmem>>, %arg2: memref<128x32xf32, #tpu.memory_space<vmem>>) attributes {dimension_semantics = [#tpu.dimension_semantics<parallel>], iteration_bounds = array<i64: 1>, scalar_prefetch = 0 : i64, scratch_operands = 0 : i64, tpu.core_type = #tpu.core_type<tc>, window_params = [{transform_indices = @transform_0, window_bounds = array<i64: 128, 32>}, {transform_indices = @transform_1, window_bounds = array<i64: 128, 32>}]} {
    %c0 = arith.constant 0 : index
    %c0_0 = arith.constant 0 : index
    %0 = vector.load %arg1[%c0, %c0_0] : memref<128x32xf32, #tpu.memory_space<vmem>>, vector<128x32xf32>
    %1 = arith.mulf %0, %0 : vector<128x32xf32>
    %cst = arith.constant dense<0.000000e+00> : vector<128xf32>
    %2 = vector.multi_reduction <add>, %1, %cst [1] : vector<128x32xf32> to vector<128xf32>
    %3 = vector.shape_cast %2 : vector<128xf32> to vector<128x1xf32>
    %4 = math.sqrt %3 : vector<128x1xf32>
    %cst_1 = arith.constant 9.99999996E-13 : f32
    %5 = vector.broadcast %cst_1 : f32 to vector<128x1xf32>
    %6 = arith.maximumf %4, %5 : vector<128x1xf32>
    %cst_2 = arith.constant 1.000000e+00 : f32
    %7 = vector.broadcast %cst_2 : f32 to vector<128x1xf32>
    %8 = arith.divf %7, %6 : vector<128x1xf32>
    %9 = vector.broadcast %8 : vector<128x1xf32> to vector<128x32xf32>
    %10 = arith.mulf %0, %9 : vector<128x32xf32>
    %c0_3 = arith.constant 0 : index
    %c0_4 = arith.constant 0 : index
    %11 = vector.load %arg2[%c0_3, %c0_4] : memref<128x32xf32, #tpu.memory_space<vmem>>, vector<128x32xf32>
    tpu.vector_store %arg2[%c0_3, %c0_4], %10 {strides = array<i32>} : memref<128x32xf32, #tpu.memory_space<vmem>>, vector<128x32xf32>,
    return
  }
  func.func @transform_0(%arg0: i32) -> (i32, i32) {
    %c0_i32 = arith.constant 0 : i32
    %c0_i32_0 = arith.constant 0 : i32
    return %arg0, %c0_i32 : i32, i32
  }
  func.func @transform_1(%arg0: i32) -> (i32, i32) {
    %c0_i32 = arith.constant 0 : i32
    %c0_i32_0 = arith.constant 0 : i32
    return %arg0, %c0_i32 : i32, i32
  }
}

</mosaic_0001>

<bundles_post_ra>
// kernel: tpu_custom_call.1
= control target key start
LH: loop header
LB: loop body
LE: loop exit
PB: predicated region body
PF: predicated region fallthrough
CT: control target
= control target key end

     0   :  { %vm40_vm0 = vcmask 261120   ;;  %s675_s0 = inlined_call_operand.vmem [shape: f32[128,32], index: 0, kind: input, shape index: {}]   ;;  %s676_s1 = inlined_call_operand.vmem [shape: f32[128,32], index: 1, kind: output, shape index: {}]  }
   0x1   :  { %v362_v0 = vld [vmem:[%s675_s0 + $0x10] sm:$0xff]  ;;  %v367_v1 = vld [vmem:[%s675_s0] sm:$0xff]  ;;  %v372_v2 = vld [vmem:[%s675_s0 + $0x18] sm:$0xff] }
   0x2   :  { %v26_v3 = vmul.f32 %v362_v0, %v362_v0  ;;  %v24_v4 = vmul.f32 %v367_v1, %v367_v1  ;;  %v27_v5 = vmul.f32 %v372_v2, %v372_v2  ;;  %v383_v6 = vld [vmem:[%s675_s0 + $0x8] sm:$0xff]  ;;  %v395_v9 = vld [vmem:[%s675_s0 + $0x20] sm:$0xff]  ;;  %v408_v16 = vld [vmem:[%s675_s0 + $0x38] sm:$0xff] }
   0x3   :  { %v25_v7 = vmul.f32 %v383_v6, %v383_v6  ;;  %v390_v8 = vld [vmem:[%s675_s0 + $0x28] sm:$0xff]  ;;  %v28_v15 = vmul.f32 %v395_v9, %v395_v9  ;;  %v413_v17 = vld [vmem:[%s675_s0 + $0x30] sm:$0xff]  ;;  %v31_v20 = vmul.f32 %v408_v16, %v408_v16  ;;  %v429_v23 = vld [vmem:[%s675_s0 + $0x40] sm:$0xff] }
   0x4   :  { %v47_v10 = vsel %vm40_vm0, %v26_v3, 0.0  ;;  %v41_v11 = vsel %vm40_vm0, %v24_v4, 0.0  ;;  %v50_v12 = vsel %vm40_vm0, %v27_v5, 0.0  ;;  %v29_v14 = vmul.f32 %v390_v8, %v390_v8  ;;  %v424_v22 = vld [vmem:[%s675_s0 + $0x48] sm:$0xff]  ;;  %v440_v28 = vld [vmem:[%s675_s0 + $0x58] sm:$0xff]  ;;  %v445_v29 = vld [vmem:[%s675_s0 + $0x50] sm:$0xff] }
   0x5   :  { %48 = vadd.xlane.f32.xlu1 %v47_v10  ;;  %42 = vadd.xlane.f32.xlu0 %v41_v11  ;;  %v44_v13 = vsel %vm40_vm0, %v25_v7, 0.0  ;;  %v53_v19 = vsel %vm40_vm0, %v28_v15, 0.0  ;;  %v30_v21 = vmul.f32 %v413_v17, %v413_v17  ;;  %v62_v24 = vsel %vm40_vm0, %v31_v20, 0.0  ;;  %v456_v34 = vld [vmem:[%s675_s0 + $0x68] sm:$0xff]  ;;  %v461_v35 = vld [vmem:[%s675_s0 + $0x60] sm:$0xff]  ;;  %v472_v40 = vld [vmem:[%s675_s0 + $0x78] sm:$0xff] }
   0x6   :  { %v56_v18 = vsel %vm40_vm0, %v29_v14, 0.0  ;;  %v33_v26 = vmul.f32 %v424_v22, %v424_v22  ;;  %v32_v27 = vmul.f32 %v429_v23, %v429_v23  ;;  %v35_v32 = vmul.f32 %v440_v28, %v440_v28  ;;  %v477_v41 = vld [vmem:[%s675_s0 + $0x70] sm:$0xff] }
   0x7   :  { %v59_v25 = vsel %vm40_vm0, %v30_v21, 0.0  ;;  %v34_v33 = vmul.f32 %v445_v29, %v445_v29  ;;  %v37_v38 = vmul.f32 %v456_v34, %v456_v34  ;;  %v36_v39 = vmul.f32 %v461_v35, %v461_v35 }
   0x8   :  { %v68_v30 = vsel %vm40_vm0, %v33_v26, 0.0  ;;  %v65_v31 = vsel %vm40_vm0, %v32_v27, 0.0  ;;  %v74_v36 = vsel %vm40_vm0, %v35_v32, 0.0  ;;  %v39_v44 = vmul.f32 %v472_v40, %v472_v40 }
   0x9   :  { %51 = vadd.xlane.f32.xlu1 %v50_v12  ;;  %45 = vadd.xlane.f32.xlu0 %v44_v13  ;;  %v71_v37 = vsel %vm40_vm0, %v34_v33, 0.0  ;;  %v80_v42 = vsel %vm40_vm0, %v37_v38, 0.0  ;;  %v77_v43 = vsel %vm40_vm0, %v36_v39, 0.0  ;;  %v38_v45 = vmul.f32 %v477_v41, %v477_v41 }
   0xa   :  { %v86_v46 = vsel %vm40_vm0, %v39_v44, 0.0 }
   0xb   :  { %v83_v47 = vsel %vm40_vm0, %v38_v45, 0.0 }
   0xd   :  { %57 = vadd.xlane.f32.xlu1 %v56_v18  ;;  %54 = vadd.xlane.f32.xlu0 %v53_v19 }
  0x11   :  { %63 = vadd.xlane.f32.xlu1 %v62_v24  ;;  %60 = vadd.xlane.f32.xlu0 %v59_v25 }
  0x15   :  { %69 = vadd.xlane.f32.xlu1 %v68_v30  ;;  %66 = vadd.xlane.f32.xlu0 %v65_v31 }
  0x19   :  { %75 = vadd.xlane.f32.xlu1 %v74_v36  ;;  %72 = vadd.xlane.f32.xlu0 %v71_v37 }
  0x1d   :  { %81 = vadd.xlane.f32.xlu1 %v80_v42  ;;  %78 = vadd.xlane.f32.xlu0 %v77_v43 }
  0x21   :  { %87 = vadd.xlane.f32.xlu1 %v86_v46  ;;  %84 = vadd.xlane.f32.xlu0 %v83_v47 }
  0x92   :  { %v49_v48 = vpop.xlane.xlu1 %48  ;;  %v43_v49 = vpop.xlane.xlu0 %42 }
  0x93   :  { %285 = vrsqrt.f32 %v49_v48  ;;  %vm105_vm1 = vcmp.eq.f32.partialorder %v49_v48, inf  ;;  %vm107_vm2 = vcmp.eq.f32.partialorder %v49_v48, 0.0  ;;  %v108_v57 = vand.u32 2147483648, %v49_v48 }
  0x94   :  { %287 = vrsqrt.f32 %v43_v49  ;;  %vm91_vm3 = vcmp.eq.f32.partialorder %v43_v49, inf  ;;  %vm93_vm4 = vcmp.eq.f32.partialorder %v43_v49, 0.0  ;;  %v94_v61 = vand.u32 2147483648, %v43_v49 }
  0x96   :  { %v52_v50 = vpop.xlane.xlu1 %51  ;;  %v46_v51 = vpop.xlane.xlu0 %45 }
  0x97   :  { %289 = vrsqrt.f32 %v52_v50  ;;  %vm112_vm5 = vcmp.eq.f32.partialorder %v52_v50, inf  ;;  %vm114_vm6 = vcmp.eq.f32.partialorder %v52_v50, 0.0  ;;  %v115_v5 = vand.u32 2147483648, %v52_v50 }
  0x98   :  { %291 = vrsqrt.f32 %v46_v51  ;;  %vm98_vm7 = vcmp.eq.f32.partialorder %v46_v51, inf  ;;  %vm100_vm8 = vcmp.eq.f32.partialorder %v46_v51, 0.0  ;;  %v101_v19 = vand.u32 2147483648, %v46_v51 }
  0x9a   :  { %v487_v52 = vpop.xlane.xlu1 %57  ;;  %v489_v53 = vpop.xlane.xlu0 %54 }
  0x9b   :  { %293 = vrsqrt.f32 %v487_v52  ;;  %vm126_vm9 = vcmp.eq.f32.partialorder %v487_v52, inf  ;;  %vm128_vm10 = vcmp.eq.f32.partialorder %v487_v52, 0.0  ;;  %v129_v26 = vand.u32 2147483648, %v487_v52 }
  0x9c   :  { %295 = vrsqrt.f32 %v489_v53  ;;  %vm119_vm11 = vcmp.eq.f32.partialorder %v489_v53, inf  ;;  %vm121_vm12 = vcmp.eq.f32.partialorder %v489_v53, 0.0  ;;  %v122_v42 = vand.u32 2147483648, %v489_v53 }
  0x9d   :  { %v286_v54 = vpop.eup %285 }
  0x9e   :  { %v288_v55 = vpop.eup %287  ;;  %v104_v56 = vmul.f32 %v286_v54, %v49_v48  ;;  %v493_v58 = vpop.xlane.xlu1 %63 }
  0x9f   :  { %v495_v59 = vpop.xlane.xlu0 %60  ;;  %v90_v60 = vmul.f32 %v288_v55, %v43_v49  ;;  %297 = vrsqrt.f32 %v493_v58  ;;  %vm140_vm13 = vcmp.eq.f32.partialorder %v493_v58, inf  ;;  %vm142_vm14 = vcmp.eq.f32.partialorder %v493_v58, 0.0 }
  0xa0   :  { %v106_v62 = vsel %vm105_vm1, %v49_v48, %v104_v56  ;;  %299 = vrsqrt.f32 %v495_v59  ;;  %v143_v54 = vand.u32 2147483648, %v493_v58  ;;  %vm133_vm15 = vcmp.eq.f32.partialorder %v495_v59, inf }
  0xa1   :  { %v290_v63 = vpop.eup %289  ;;  %v109_v3 = vsel %vm107_vm2, %v108_v57, %v106_v62  ;;  %v92_v4 = vsel %vm91_vm3, %v43_v49, %v90_v60  ;;  %vm135_vm1 = vcmp.eq.f32.partialorder %v495_v59, 0.0 }
  0xa2   :  { %v292_v7 = vpop.eup %291  ;;  %v203_v10 = vmax.f32 %v109_v3, 1e-12  ;;  %v95_v11 = vsel %vm93_vm4, %v94_v61, %v92_v4  ;;  %v111_v12 = vmul.f32 %v290_v63, %v52_v50  ;;  %v499_v13 = vpop.xlane.xlu1 %69 }
  0xa3   :  { %v501_v14 = vpop.xlane.xlu0 %66  ;;  %v201_v15 = vmax.f32 %v95_v11, 1e-12  ;;  %v97_v18 = vmul.f32 %v292_v7, %v46_v51  ;;  %301 = vrsqrt.f32 %v499_v13  ;;  %vm154_vm2 = vcmp.eq.f32.partialorder %v499_v13, inf }
  0xa4   :  { %303 = vrcp.f32 %v203_v10  ;;  %v113_v20 = vsel %vm112_vm5, %v52_v50, %v111_v12  ;;  %vm156_vm3 = vcmp.eq.f32.partialorder %v499_v13, 0.0  ;;  %vm147_vm4 = vcmp.eq.f32.partialorder %v501_v14, inf }
  0xa5   :  { %v294_v21 = vpop.eup %293  ;;  %305 = vrcp.f32 %v201_v15  ;;  %v116_v24 = vsel %vm114_vm6, %v115_v5, %v113_v20  ;;  %v99_v25 = vsel %vm98_vm7, %v46_v51, %v97_v18  ;;  %vm149_vm5 = vcmp.eq.f32.partialorder %v501_v14, 0.0 }
  0xa6   :  { %v296_v27 = vpop.eup %295  ;;  %v204_v30 = vmax.f32 %v116_v24, 1e-12  ;;  %v102_v31 = vsel %vm100_vm8, %v101_v19, %v99_v25  ;;  %v125_v32 = vmul.f32 %v294_v21, %v487_v52  ;;  %307 = vrsqrt.f32 %v501_v14  ;;  %v513_v33 = vpop.xlane.xlu1 %75 }
  0xa7   :  { %v515_v36 = vpop.xlane.xlu0 %72  ;;  %v202_v37 = vmax.f32 %v102_v31, 1e-12  ;;  %v118_v38 = vmul.f32 %v296_v27, %v489_v53  ;;  %vm168_vm6 = vcmp.eq.f32.partialorder %v513_v33, inf  ;;  %vm170_vm7 = vcmp.eq.f32.partialorder %v513_v33, 0.0 }
  0xa8   :  { %309 = vrcp.f32 %v204_v30  ;;  %v127_v39 = vsel %vm126_vm9, %v487_v52, %v125_v32  ;;  %vm161_vm8 = vcmp.eq.f32.partialorder %v515_v36, inf  ;;  %vm163_vm9 = vcmp.eq.f32.partialorder %v515_v36, 0.0 }
  0xa9   :  { %v298_v43 = vpop.eup %297  ;;  %311 = vrcp.f32 %v202_v37  ;;  %v130_v44 = vsel %vm128_vm10, %v129_v26, %v127_v39  ;;  %v120_v45 = vsel %vm119_vm11, %v489_v53, %v118_v38  ;;  %v136_v53 = vand.u32 2147483648, %v495_v59 }
  0xaa   :  { %v300_v46 = vpop.eup %299  ;;  %v206_v47 = vmax.f32 %v130_v44, 1e-12  ;;  %v123_v48 = vsel %vm121_vm12, %v122_v42, %v120_v45  ;;  %v139_v49 = vmul.f32 %v298_v43, %v493_v58  ;;  %313 = vrsqrt.f32 %v513_v33  ;;  %v531_v50 = vpop.xlane.xlu1 %81 }
  0xab   :  { %v205_v51 = vmax.f32 %v123_v48, 1e-12  ;;  %v132_v55 = vmul.f32 %v300_v46, %v495_v59  ;;  %315 = vrsqrt.f32 %v515_v36  ;;  %v541_v56 = vpop.xlane.xlu0 %78  ;;  %v164_v43 = vand.u32 2147483648, %v515_v36 }
  0xac   :  { %317 = vrcp.f32 %v206_v47  ;;  %v141_v52 = vsel %vm140_vm13, %v493_v58, %v139_v49  ;;  %v157_v58 = vand.u32 2147483648, %v499_v13  ;;  %vm182_vm10 = vcmp.eq.f32.partialorder %v531_v50, inf }
  0xad   :  { %v302_v57 = vpop.eup %301  ;;  %319 = vrcp.f32 %v205_v51  ;;  %v144_v60 = vsel %vm142_vm14, %v143_v54, %v141_v52  ;;  %v134_v61 = vsel %vm133_vm15, %v495_v59, %v132_v55  ;;  %vm184_vm11 = vcmp.eq.f32.partialorder %v531_v50, 0.0 }
  0xae   :  { %v304_v62 = vpop.eup %303  ;;  %v208_v63 = vmax.f32 %v144_v60, 1e-12  ;;  %v137_v3 = vsel %vm135_vm1, %v136_v53, %v134_v61  ;;  %v153_v4 = vmul.f32 %v302_v57, %v499_v13  ;;  %321 = vrsqrt.f32 %v531_v50  ;;  %v555_v15 = vpop.xlane.xlu1 %87 }
  0xaf   :  { %v306_v5 = vpop.eup %305  ;;  %v251_v7 = vmul.f32 %v304_v62, %v362_v0  ;;  %v207_v10 = vmax.f32 %v137_v3, 1e-12  ;;  %v569_v20 = vpop.xlane.xlu0 %84  ;;  %vm175_vm12 = vcmp.eq.f32.partialorder %v541_v56, inf  ;;  %vm177_vm13 = vcmp.eq.f32.partialorder %v541_v56, 0.0 }
  0xb0   :  { %v308_v11 = vpop.eup %307  ;;  %v249_v12 = vmul.f32 %v306_v5, %v367_v1  ;;  %323 = vrcp.f32 %v208_v63  ;;  %v155_v59 = vsel %vm154_vm2, %v499_v13, %v153_v4  ;;  %v150_v13 = vand.u32 2147483648, %v501_v14 }
  0xb1   :  { %267 = vst.msk [vmem:[%s676_s1 + $0x10] sm:$0xff] %vm40_vm0, %v251_v7  ;;  %325 = vrcp.f32 %v207_v10  ;;  %v158_v0 = vsel %vm156_vm3, %v157_v58, %v155_v59  ;;  %v146_v18 = vmul.f32 %v308_v11, %v501_v14  ;;  %vm196_vm14 = vcmp.eq.f32.partialorder %v555_v15, inf }
  0xb2   :  { %v310_v19 = vpop.eup %309  ;;  %265 = vst.msk [vmem:[%s676_s1] sm:$0xff] %vm40_vm0, %v249_v12  ;;  %v210_v1 = vmax.f32 %v158_v0, 1e-12  ;;  %327 = vrsqrt.f32 %v541_v56  ;;  %v199_v5 = vand.u32 2147483648, %v555_v15  ;;  %vm198_vm15 = vcmp.eq.f32.partialorder %v555_v15, 0.0 }
  0xb3   :  { %v312_v21 = vpop.eup %311  ;;  %v252_v24 = vmul.f32 %v310_v19, %v372_v2  ;;  %v148_v25 = vsel %vm147_vm4, %v501_v14, %v146_v18  ;;  %329 = vrsqrt.f32 %v555_v15  ;;  %vm189_vm1 = vcmp.eq.f32.partialorder %v569_v20, inf }
  0xb4   :  { %v314_v26 = vpop.eup %313  ;;  %v250_v27 = vmul.f32 %v312_v21, %v383_v6  ;;  %331 = vrcp.f32 %v210_v1  ;;  %v151_v30 = vsel %vm149_vm5, %v150_v13, %v148_v25  ;;  %v171_v6 = vand.u32 2147483648, %v513_v33 }
  0xb5   :  { %v316_v31 = vpop.eup %315  ;;  %268 = vst.msk [vmem:[%s676_s1 + $0x18] sm:$0xff] %vm40_vm0, %v252_v24  ;;  %v209_v32 = vmax.f32 %v151_v30, 1e-12  ;;  %v167_v2 = vmul.f32 %v314_v26, %v513_v33  ;;  %333 = vrsqrt.f32 %v569_v20  ;;  %vm191_vm2 = vcmp.eq.f32.partialorder %v569_v20, 0.0 }
  0xb6   :  { %v318_v14 = vpop.eup %317  ;;  %266 = vst.msk [vmem:[%s676_s1 + $0x8] sm:$0xff] %vm40_vm0, %v250_v27  ;;  %v160_v37 = vmul.f32 %v316_v31, %v515_v36 }
  0xb7   :  { %v320_v38 = vpop.eup %319  ;;  %v254_v39 = vmul.f32 %v318_v14, %v390_v8  ;;  %335 = vrcp.f32 %v209_v32  ;;  %v169_v42 = vsel %vm168_vm6, %v513_v33, %v167_v2 }
  0xb8   :  { %v322_v44 = vpop.eup %321  ;;  %v253_v45 = vmul.f32 %v320_v38, %v395_v9  ;;  %v172_v46 = vsel %vm170_vm7, %v171_v6, %v169_v42  ;;  %v162_v47 = vsel %vm161_vm8, %v515_v36, %v160_v37  ;;  %v185_v36 = vand.u32 2147483648, %v531_v50 }
  0xb9   :  { %270 = vst.msk [vmem:[%s676_s1 + $0x28] sm:$0xff] %vm40_vm0, %v254_v39  ;;  %v212_v48 = vmax.f32 %v172_v46, 1e-12  ;;  %v165_v8 = vsel %vm163_vm9, %v164_v43, %v162_v47  ;;  %v181_v49 = vmul.f32 %v322_v44, %v531_v50 }
  0xba   :  { %v324_v33 = vpop.eup %323  ;;  %269 = vst.msk [vmem:[%s676_s1 + $0x20] sm:$0xff] %vm40_vm0, %v253_v45  ;;  %v211_v9 = vmax.f32 %v165_v8, 1e-12 }
  0xbb   :  { %v326_v51 = vpop.eup %325  ;;  %v256_v54 = vmul.f32 %v324_v33, %v408_v16  ;;  %337 = vrcp.f32 %v212_v48  ;;  %v183_v55 = vsel %vm182_vm10, %v531_v50, %v181_v49 }
  0xbc   :  { %v328_v52 = vpop.eup %327  ;;  %v255_v53 = vmul.f32 %v326_v51, %v413_v17  ;;  %339 = vrcp.f32 %v211_v9  ;;  %v186_v57 = vsel %vm184_vm11, %v185_v36, %v183_v55  ;;  %v178_v17 = vand.u32 2147483648, %v541_v56 }
  0xbd   :  { %v330_v60 = vpop.eup %329  ;;  %272 = vst.msk [vmem:[%s676_s1 + $0x38] sm:$0xff] %vm40_vm0, %v256_v54  ;;  %v214_v61 = vmax.f32 %v186_v57, 1e-12  ;;  %v174_v62 = vmul.f32 %v328_v52, %v541_v56 }
  0xbe   :  { %v332_v16 = vpop.eup %331  ;;  %271 = vst.msk [vmem:[%s676_s1 + $0x30] sm:$0xff] %vm40_vm0, %v255_v53  ;;  %v195_v50 = vmul.f32 %v330_v60, %v555_v15 }
  0xbf   :  { %v334_v63 = vpop.eup %333  ;;  %v258_v3 = vmul.f32 %v332_v16, %v424_v22  ;;  %341 = vrcp.f32 %v214_v61  ;;  %v176_v4 = vsel %vm175_vm12, %v541_v56, %v174_v62  ;;  %v192_v56 = vand.u32 2147483648, %v569_v20 }
  0xc0   :  { %v179_v7 = vsel %vm177_vm13, %v178_v17, %v176_v4  ;;  %v197_v10 = vsel %vm196_vm14, %v555_v15, %v195_v50  ;;  %v188_v58 = vmul.f32 %v334_v63, %v569_v20 }
  0xc1   :  { %v336_v11 = vpop.eup %335  ;;  %274 = vst.msk [vmem:[%s676_s1 + $0x48] sm:$0xff] %vm40_vm0, %v258_v3  ;;  %v213_v12 = vmax.f32 %v179_v7, 1e-12  ;;  %v200_v22 = vsel %vm198_vm15, %v199_v5, %v197_v10 }
  0xc2   :  { %v257_v59 = vmul.f32 %v336_v11, %v429_v23  ;;  %v216_v0 = vmax.f32 %v200_v22, 1e-12  ;;  %v190_v18 = vsel %vm189_vm1, %v569_v20, %v188_v58 }
  0xc3   :  { %343 = vrcp.f32 %v213_v12  ;;  %v193_v15 = vsel %vm191_vm2, %v192_v56, %v190_v18 }
  0xc4   :  { %273 = vst.msk [vmem:[%s676_s1 + $0x40] sm:$0xff] %vm40_vm0, %v257_v59  ;;  %345 = vrcp.f32 %v216_v0  ;;  %v215_v19 = vmax.f32 %v193_v15, 1e-12 }
  0xc5   :  { %v338_v1 = vpop.eup %337 }
  0xc6   :  { %v340_v13 = vpop.eup %339  ;;  %v260_v21 = vmul.f32 %v338_v1, %v440_v28  ;;  %347 = vrcp.f32 %v215_v19 }
  0xc7   :  { %v259_v23 = vmul.f32 %v340_v13, %v445_v29 }
  0xc8   :  { %276 = vst.msk [vmem:[%s676_s1 + $0x58] sm:$0xff] %vm40_vm0, %v260_v21 }
  0xc9   :  { %v342_v20 = vpop.eup %341  ;;  %275 = vst.msk [vmem:[%s676_s1 + $0x50] sm:$0xff] %vm40_vm0, %v259_v23 }
  0xca   :  { %v262_v24 = vmul.f32 %v342_v20, %v456_v34 }
  0xcc   :  { %278 = vst.msk [vmem:[%s676_s1 + $0x68] sm:$0xff] %vm40_vm0, %v262_v24 }
  0xcd   :  { %v344_v28 = vpop.eup %343 }
  0xce   :  { %v346_v29 = vpop.eup %345  ;;  %v261_v25 = vmul.f32 %v344_v28, %v461_v35 }
  0xcf   :  { %v264_v26 = vmul.f32 %v346_v29, %v472_v40 }
  0xd0   :  { %v348_v27 = vpop.eup %347  ;;  %277 = vst.msk [vmem:[%s676_s1 + $0x60] sm:$0xff] %vm40_vm0, %v261_v25 }
  0xd1   :  { %280 = vst.msk [vmem:[%s676_s1 + $0x78] sm:$0xff] %vm40_vm0, %v264_v26  ;;  %v263_v34 = vmul.f32 %v348_v27, %v477_v41 }
  0xd3   :  { %279 = vst.msk [vmem:[%s676_s1 + $0x70] sm:$0xff] %vm40_vm0, %v263_v34 }

</bundles_post_ra>
